<compile_context>
chip_gen: v6e
topology: v6e:2x2x1
jax: 0.10.0
libtpu: 0.0.40
codegen_flags: <defaults>
</compile_context>

<pallas_src>
import functools

import jax
import jax.numpy as jnp
from jax.experimental import pallas as pl
from jax.experimental.pallas import tpu as pltpu


def _gat_attn_kernel(ad_ref, as_ref, mask_ref, h_ref, out_ref, *, negative_slope):
    """One (row-tile, head) grid step: masked softmax over sources + AV matmul."""
    a_d = ad_ref[...]                                     # [TM, 1]  f32  (targets i)
    a_s = as_ref[...]                                     # [1,  Np] f32  (sources j)
    raw = a_d + a_s                                       # [TM, Np]
    e = jnp.where(raw > 0, raw, negative_slope * raw)     # LeakyReLU
    e = e + mask_ref[...].astype(jnp.float32)             # additive adjacency mask (0 / -1e9)
    m = jnp.max(e, axis=-1, keepdims=True)
    p = jnp.exp(e - m)                                    # masked entries underflow to exactly 0
    denom = jnp.sum(p, axis=-1, keepdims=True)
    attn = (p * pl.reciprocal(denom, approx=True)).astype(jnp.bfloat16)
    # bf16 x bf16 MXU matmul with f32 accumulation; single full-block store.
    out_ref[...] = jnp.dot(attn, h_ref[...], preferred_element_type=jnp.float32)


def _pick_tiling(n_src_lanes):
    """Generation-aware (v5e/v6e vs v7x) row-tile size and VMEM limit."""
    try:
        vmem = int(getattr(pltpu.get_tpu_info(), "vmem_capacity_bytes",
                           64 * 1024 * 1024))
    except Exception:
        vmem = 64 * 1024 * 1024                        # conservative (v7x-sized)
    if vmem >= 100 * 1024 * 1024:                      # v5e / v6e: 128 MiB physical VMEM
        tm, limit = 512, 96 * 1024 * 1024
    else:                                              # v7x: 64 MiB per TensorCore
        tm, limit = 128, 40 * 1024 * 1024
    # ~ mask tile (bf16, double-buffered) + a few live f32 [TM, Np] softmax temps.
    while tm > 128 and tm * n_src_lanes * 20 > limit // 2:
        tm //= 2
    return tm, limit


def gat_layer(x, edge_index, W, a_src, a_dst, bias, *, num_heads, out_features,
              negative_slope=0.2, concat=True, tile_rows=None):
    """Pallas GAT layer.  x: [N, F_in]; edge_index: [2, E] (row0=src, row1=dst)."""
    N, _ = x.shape
    H, F = num_heads, out_features

    # ---- hoisted projections (O(N*F); the kernel keeps the O(N^2*H) attention) --
    h = (x @ W).astype(jnp.float32)                       # [N, H*F]
    h_heads = h.reshape(N, H, F)
    alpha_s = jnp.einsum("nhf,hf->hn", h_heads, a_src)    # [H, N]  source-side logits
    alpha_d = jnp.einsum("nhf,hf->hn", h_heads, a_dst)    # [H, N]  target-side logits
    h_hm = jnp.transpose(h_heads, (1, 0, 2)).astype(jnp.bfloat16)   # [H, N, F] bf16

    # ---- row tiling with padding (no single-tile fallback cliff) ----------------
    n_lanes_est = max(128, pl.cdiv(N, 128) * 128)
    auto_tm, vmem_limit = _pick_tiling(n_lanes_est)
    if tile_rows is None:
        tm = min(auto_tm, max(16, pl.cdiv(N, 128) * 128))
    else:
        tm = max(16, -(-int(tile_rows) // 16) * 16)
    n_pad = pl.cdiv(N, tm) * tm
    pad = n_pad - N
    if pad:
        h_hm = jnp.pad(h_hm, ((0, 0), (0, pad), (0, 0)))
        alpha_s = jnp.pad(alpha_s, ((0, 0), (0, pad)))
        alpha_d = jnp.pad(alpha_d, ((0, 0), (0, pad)))
    alpha_s = alpha_s.reshape(H, 1, n_pad)
    alpha_d = alpha_d.reshape(H, n_pad, 1)

    # ---- dense additive adjacency mask, bf16 (the only O(N^2) stream) -----------
    # TODO(synk): parallel (duplicate) edges collapse to one dense-mask entry.
    # TODO(synk): dense [N,N] mask is materialized in the wrapper; O(N^2) for big graphs.
    src, dst = edge_index[0], edge_index[1]
    adj = jnp.zeros((n_pad, n_pad), dtype=bool)
    adj = adj.at[dst, src].set(True)
    adj = adj.at[jnp.arange(N), jnp.arange(N)].set(True)       # self-loops (PyG default)
    mask_bias = jnp.where(adj, 0.0, -1e9).astype(jnp.bfloat16)

    grid = (n_pad // tm, H)                                    # heads = inner grid axis
    kernel = functools.partial(_gat_attn_kernel, negative_slope=negative_slope)

    out_heads = pl.pallas_call(
        kernel,
        out_shape=jax.ShapeDtypeStruct((H, n_pad, F), jnp.float32),
        grid=grid,
        in_specs=[
            pl.BlockSpec((None, tm, 1), lambda i, hd: (hd, i, 0)),      # alpha_d tile
            pl.BlockSpec((None, 1, n_pad), lambda i, hd: (hd, 0, 0)),   # alpha_s row
            pl.BlockSpec((tm, n_pad), lambda i, hd: (i, 0)),            # bf16 mask tile (resident across heads)
            pl.BlockSpec((None, n_pad, F), lambda i, hd: (hd, 0, 0)),   # bf16 h for this head
        ],
        out_specs=pl.BlockSpec((None, tm, F), lambda i, hd: (hd, i, 0)),  # head-major output
        compiler_params=pltpu.CompilerParams(
            dimension_semantics=("parallel", "arbitrary"),              # shard row tiles across TCs
            vmem_limit_bytes=vmem_limit),
    )(alpha_d, alpha_s, mask_bias, h_hm)

    out_heads = out_heads[:, :N, :]                            # drop padded target rows
    if concat:
        return jnp.transpose(out_heads, (1, 0, 2)).reshape(N, H * F) + bias
    return jnp.mean(out_heads, axis=0) + bias


def _gat_reference(x, edge_index, W, a_src, a_dst, bias, *, num_heads, out_features,
                   negative_slope=0.2, concat=True):
    """Pure-JAX reference with identical dense-mask semantics."""
    N = x.shape[0]
    src, dst = edge_index[0], edge_index[1]
    adj = jnp.zeros((N, N), jnp.float32).at[dst, src].set(1.0)
    adj = adj.at[jnp.arange(N), jnp.arange(N)].set(1.0)

    h = (x @ W).reshape(N, num_heads, out_features)                   # [N, H, F]
    alpha_s = jnp.einsum("nhf,hf->nh", h, a_src)                      # [N, H]
    alpha_d = jnp.einsum("nhf,hf->nh", h, a_dst)                      # [N, H]
    e = alpha_d[:, None, :] + alpha_s[None, :, :]                     # [N(i), N(j), H]
    e = jnp.where(e > 0, e, negative_slope * e)
    e = jnp.where(adj[:, :, None] > 0, e, -1e9)
    p = jnp.exp(e - jnp.max(e, axis=1, keepdims=True))
    p = jnp.where(adj[:, :, None] > 0, p, 0.0)
    attn = p / jnp.sum(p, axis=1, keepdims=True)                      # [N, N, H]
    out = jnp.einsum("ijh,jhf->ihf", attn, h)                         # [N, H, F]
    if concat:
        out = out.reshape(N, num_heads * out_features)
    else:
        out = out.mean(axis=1)
    return out + bias


if __name__ == "__main__":
    # Module config: GraphAttentionLayer(in_features=16, out_features=8, num_heads=4,
    #                                    dropout=0.0, alpha=0.2, concat=True)
    N, F_IN, F_OUT, HEADS = 250, 16, 8, 4     # N=250 exercises the padding path (n_pad=256)
    ALPHA = 0.2

    key = jax.random.PRNGKey(0)
    k_x, k_w, k_as, k_ad, k_b1, k_b2 = jax.random.split(key, 6)

    x = jax.random.normal(k_x, (N, F_IN), dtype=jnp.float32)

    # Deterministic glorot-style parameter init (GATConv: lin weight, att_src, att_dst, bias).
    w_scale = (2.0 / (F_IN + HEADS * F_OUT)) ** 0.5
    W = jax.random.normal(k_w, (F_IN, HEADS * F_OUT), dtype=jnp.float32) * w_scale
    a_scale = (2.0 / (1 + F_OUT)) ** 0.5
    a_src = jax.random.normal(k_as, (HEADS, F_OUT), dtype=jnp.float32) * a_scale
    a_dst = jax.random.normal(k_ad, (HEADS, F_OUT), dtype=jnp.float32) * a_scale
    bias_c = 0.1 * jax.random.normal(k_b1, (HEADS * F_OUT,), dtype=jnp.float32)
    bias_m = 0.1 * jax.random.normal(k_b2, (F_OUT,), dtype=jnp.float32)

    # Small graph: bidirectional ring over N nodes.  edge_index[0]=src, edge_index[1]=dst.
    srcs = jnp.concatenate([jnp.arange(N), jnp.arange(N)])
    dsts = jnp.concatenate([(jnp.arange(N) + 1) % N, (jnp.arange(N) - 1) % N])
    edge_index = jnp.stack([srcs, dsts]).astype(jnp.int32)            # [2, 2N]

    # --- concat=True (module default) ---
    out = gat_layer(x, edge_index, W, a_src, a_dst, bias_c,
                    num_heads=HEADS, out_features=F_OUT,
                    negative_slope=ALPHA, concat=True, tile_rows=128)
    out = jax.block_until_ready(out)
    ref = _gat_reference(x, edge_index, W, a_src, a_dst, bias_c,
                         num_heads=HEADS, out_features=F_OUT,
                         negative_slope=ALPHA, concat=True)
    assert out.shape == (N, HEADS * F_OUT)
    assert jnp.allclose(out, ref, atol=2e-2, rtol=2e-2), "concat=True mismatch vs reference"

    # --- concat=False (head average) — identical kernel, wrapper-side reduction ---
    out2 = gat_layer(x, edge_index, W, a_src, a_dst, bias_m,
                     num_heads=HEADS, out_features=F_OUT,
                     negative_slope=ALPHA, concat=False, tile_rows=128)
    out2 = jax.block_until_ready(out2)
    ref2 = _gat_reference(x, edge_index, W, a_src, a_dst, bias_m,
                          num_heads=HEADS, out_features=F_OUT,
                          negative_slope=ALPHA, concat=False)
    assert out2.shape == (N, F_OUT)
    assert jnp.allclose(out2, ref2, atol=2e-2, rtol=2e-2), "concat=False mismatch vs reference"

    print("KERNEL_OK")
</pallas_src>

<mosaic_0001>
module attributes {stable_mosaic.version = 11 : i64} {
  func.func @_gat_attn_kernel(%arg0: i32, %arg1: i32, %arg2: memref<1x128x1xf32, #tpu.memory_space<vmem>>, %arg3: memref<1x1x256xf32, #tpu.memory_space<vmem>>, %arg4: memref<128x256xbf16, #tpu.memory_space<vmem>>, %arg5: memref<1x256x8xbf16, #tpu.memory_space<vmem>>, %arg6: memref<1x128x8xf32, #tpu.memory_space<vmem>>) attributes {dimension_semantics = [#tpu.dimension_semantics<parallel>, #tpu.dimension_semantics<arbitrary>], iteration_bounds = array<i64: 2, 4>, scalar_prefetch = 0 : i64, scratch_operands = 0 : i64, tpu.core_type = #tpu.core_type<tc>, window_params = [{transform_indices = @transform_0, window_bounds = array<i64: 1, 128, 1>}, {transform_indices = @transform_1, window_bounds = array<i64: 1, 1, 256>}, {transform_indices = @transform_2, window_bounds = array<i64: 128, 256>}, {transform_indices = @transform_3, window_bounds = array<i64: 1, 256, 8>}, {transform_indices = @transform_4, window_bounds = array<i64: 1, 128, 8>}]} {
    %c0 = arith.constant 0 : index
    %c0_0 = arith.constant 0 : index
    %c0_1 = arith.constant 0 : index
    %0 = vector.load %arg2[%c0, %c0_0, %c0_1] : memref<1x128x1xf32, #tpu.memory_space<vmem>>, vector<1x128x1xf32>
    %1 = vector.shape_cast %0 : vector<1x128x1xf32> to vector<128x1xf32>
    %c0_2 = arith.constant 0 : index
    %c0_3 = arith.constant 0 : index
    %c0_4 = arith.constant 0 : index
    %2 = vector.load %arg3[%c0_2, %c0_3, %c0_4] : memref<1x1x256xf32, #tpu.memory_space<vmem>>, vector<1x1x256xf32>
    %3 = vector.shape_cast %2 : vector<1x1x256xf32> to vector<1x256xf32>
    %4 = vector.broadcast %1 : vector<128x1xf32> to vector<128x256xf32>
    %5 = vector.broadcast %3 : vector<1x256xf32> to vector<128x256xf32>
    %6 = arith.addf %4, %5 : vector<128x256xf32>
    %cst = arith.constant 0.000000e+00 : f32
    %7 = vector.broadcast %cst : f32 to vector<128x256xf32>
    %8 = arith.cmpf ogt, %6, %7 : vector<128x256xf32>
    %cst_5 = arith.constant 2.000000e-01 : f32
    %9 = vector.broadcast %cst_5 : f32 to vector<128x256xf32>
    %10 = arith.mulf %9, %6 : vector<128x256xf32>
    %11 = arith.select %8, %6, %10 : vector<128x256xi1>, vector<128x256xf32>
    %c0_6 = arith.constant 0 : index
    %c0_7 = arith.constant 0 : index
    %12 = vector.load %arg4[%c0_6, %c0_7] : memref<128x256xbf16, #tpu.memory_space<vmem>>, vector<128x256xbf16>
    %13 = arith.extf %12 : vector<128x256xbf16> to vector<128x256xf32>
    %14 = arith.addf %11, %13 : vector<128x256xf32>
    %cst_8 = arith.constant dense<0xFF800000> : vector<128xf32>
    %15 = vector.multi_reduction <maximumf>, %14, %cst_8 [1] : vector<128x256xf32> to vector<128xf32>
    %16 = vector.shape_cast %15 : vector<128xf32> to vector<128x1xf32>
    %17 = vector.broadcast %16 : vector<128x1xf32> to vector<128x256xf32>
    %18 = arith.subf %14, %17 : vector<128x256xf32>
    %19 = math.exp %18 : vector<128x256xf32>
    %cst_9 = arith.constant dense<0.000000e+00> : vector<128xf32>
    %20 = vector.multi_reduction <add>, %19, %cst_9 [1] : vector<128x256xf32> to vector<128xf32>
    %21 = vector.shape_cast %20 : vector<128xf32> to vector<128x1xf32>
    %22 = tpu.reciprocal %21 {approx = true} : vector<128x1xf32> -> vector<128x1xf32>
    %23 = vector.broadcast %22 : vector<128x1xf32> to vector<128x256xf32>
    %24 = arith.mulf %19, %23 : vector<128x256xf32>
    %25 = arith.truncf %24 : vector<128x256xf32> to vector<128x256xbf16>
    %c0_10 = arith.constant 0 : index
    %c0_11 = arith.constant 0 : index
    %c0_12 = arith.constant 0 : index
    %26 = vector.load %arg5[%c0_10, %c0_11, %c0_12] : memref<1x256x8xbf16, #tpu.memory_space<vmem>>, vector<1x256x8xbf16>
    %27 = vector.shape_cast %26 : vector<1x256x8xbf16> to vector<256x8xbf16>
    %cst_13 = arith.constant dense<0.000000e+00> : vector<128x8xf32>
    %28 = tpu.matmul %25, %27, %cst_13 {dimension_numbers = #tpu.dot_dimension_numbers<[1], [0], [0], [1], [0, 0, 1, 1], [], []>} : vector<128x256xbf16>, vector<256x8xbf16>, vector<128x8xf32> -> vector<128x8xf32>
    %c0_14 = arith.constant 0 : index
    %c0_15 = arith.constant 0 : index
    %c0_16 = arith.constant 0 : index
    %29 = vector.load %arg6[%c0_14, %c0_15, %c0_16] : memref<1x128x8xf32, #tpu.memory_space<vmem>>, vector<1x128x8xf32>
    %30 = vector.shape_cast %29 : vector<1x128x8xf32> to vector<128x8xf32>
    %31 = vector.shape_cast %28 : vector<128x8xf32> to vector<1x128x8xf32>
    tpu.vector_store %arg6[%c0_14, %c0_15, %c0_16], %31 {strides = array<i32>} : memref<1x128x8xf32, #tpu.memory_space<vmem>>, vector<1x128x8xf32>,
    return
  }
  func.func @transform_0(%arg0: i32, %arg1: i32) -> (i32, i32, i32) {
    %c0_i32 = arith.constant 0 : i32
    %c0_i32_0 = arith.constant 0 : i32
    return %arg1, %arg0, %c0_i32 : i32, i32, i32
  }
  func.func @transform_1(%arg0: i32, %arg1: i32) -> (i32, i32, i32) {
    %c0_i32 = arith.constant 0 : i32
    %c0_i32_0 = arith.constant 0 : i32
    %c0_i32_1 = arith.constant 0 : i32
    return %arg1, %c0_i32, %c0_i32_0 : i32, i32, i32
  }
  func.func @transform_2(%arg0: i32, %arg1: i32) -> (i32, i32) {
    %c0_i32 = arith.constant 0 : i32
    %c0_i32_0 = arith.constant 0 : i32
    return %arg0, %c0_i32 : i32, i32
  }
  func.func @transform_3(%arg0: i32, %arg1: i32) -> (i32, i32, i32) {
    %c0_i32 = arith.constant 0 : i32
    %c0_i32_0 = arith.constant 0 : i32
    %c0_i32_1 = arith.constant 0 : i32
    return %arg1, %c0_i32, %c0_i32_0 : i32, i32, i32
  }
  func.func @transform_4(%arg0: i32, %arg1: i32) -> (i32, i32, i32) {
    %c0_i32 = arith.constant 0 : i32
    %c0_i32_0 = arith.constant 0 : i32
    return %arg1, %arg0, %c0_i32 : i32, i32, i32
  }
}

</mosaic_0001>

<bundles_post_ra>
// kernel: tpu_custom_call.1
= control target key start
LH: loop header
LB: loop body
LE: loop exit
PB: predicated region body
PF: predicated region fallthrough
CT: control target
= control target key end

     0   :  { %s1578_s15 = smov 0   ;;  %s1580_s16 = smov 0   ;;  %s2290_s0 = inlined_call_operand.vmem [shape: f32[4,256,1], index: 0, kind: input, shape index: {}]   ;;  %s2291_s1 = inlined_call_operand.vmem [shape: f32[4,1,256], index: 1, kind: input, shape index: {}]   ;;  %s2292_s2 = inlined_call_operand.vmem [shape: bf16[256,256], index: 2, kind: input, shape index: {}]   ;;  %s2293_s3 = inlined_call_operand.vmem [shape: bf16[4,256,8], index: 3, kind: input, shape index: {}]   ;;  %s2294_s4 = inlined_call_operand.vmem [shape: f32[4,256,8], index: 4, kind: output, shape index: {}]  }
   0x1   :  { %s1582_s17 = smov 0   ;;  %s1584_s18 = smov 0  }
   0x2   :  { %s1586_s19 = smov 0  }
   0x3 LB: > { %s23_s20 = sadd.s32 1, %s1542_s17  ;;  %s26_s21 = sadd.s32 1, %s1546_s18  ;;  %s1550_s19 = sphi %s1586_s19, %s14_s19   ;;  %s1546_s18 = sphi %s1584_s18, %s2314_s18   ;;  %s1542_s17 = sphi %s1582_s17, %s2313_s17   ;;  %s1538_s16 = sphi %s1580_s16, %s2312_s16   ;;  %s1534_s15 = sphi %s1578_s15, %s2311_s15  }
   0x4   : > { %p24_p0 = scmp.ge.s32.totalorder %s23_s20, 4  ;;  %p1244_p1 = scmp.ge.s32.totalorder %s1550_s19, 1 }
   0x5   : > { %p214_p2 = scmp.lt.s32.totalorder %s1550_s19, 9 }
   0x6   : > { %s2316_s20 = smov (%p24_p0, %s23_s20), 0  ;;  %s2318_s21 = smov (!%p24_p0, %s26_s21), %s1546_s18 }
   0x7   : > { %p215_p3 = pnand %p1244_p1, %p214_p2  ;;  %p28_p4 = scmp.ge.s32.totalorder %s2318_s21, 2 }
   0x8   : > { %s1245_s22 = sshll.u32 (!%p215_p3), %s1538_s16, 4  ;;  %p264_p5 = scmp.lt.s32.totalorder (!%p215_p3), %s1534_s15, 3 }
   0x9   : > { %s2320_s21 = smov (%p28_p4, %s2318_s21), 0  ;;  %218 = sbr.rel (%p215_p3) target bundleno = 719 (0x2cf), region = 36 }
   0xa   : > { %p266_p6 = scmp.lt.s32.totalorder (!%p215_p3), %s1245_s22, 31 }
   0xe   : > { %v1552_v0 = vmov 0   ;;  %s2322_s15 = smov (!%p264_p5, %s1534_s15), 3  ;;  %s2324_s22 = smov (!%p266_p6, %s1245_s22), 31  ;;  %v398_v17 = vlaneseq }
   0xf   : > { %1399 = vset.pattern.permute.xlu1 %v1552_v0  ;;  %1398 = vset.pattern.permute.xlu0 %v1552_v0  ;;  %s1246_s23 = sshll.u32 %s2322_s15, 5  ;;  %s1276_s29 = sshll.u32 %s2322_s15, 7 }
  0x10   : > { %s1614_s24 = sadd.s32 %s1246_s23, %s2324_s22  ;;  %s1632_s6 = scalar_lea.vmem %s2293_s3, %s1276_s29  ;;  %v399_v18 = vshrl.u32 %v398_v17, 7 }
  0x11   : > { %s1247_s25 = sshll.u32 %s1614_s24, 3  ;;  %s1248_s7 = sshll.u32 %s2322_s15, 1 }
  0x12   : > { %s1622_s28 = scalar_lea.vmem %s2290_s0, %s1247_s25  ;;  %s1275_s8 = sshll.u32 %s2324_s22, 3  ;;  %v400_v19 = vsub.s32 0, %v399_v18  ;;  %v404_v20 = vsub.s32 1, %v399_v18 }
  0x13   : > { %v308_v1 = vld [vmem:[%s1622_s28 + $0x40] sm:$0xff]  ;;  %v309_v3 = vld [vmem:[%s1622_s28 + $0x48] sm:$0xff]  ;;  %v303_v5 = vld [vmem:[%s1622_s28 + $0x18] sm:$0xff]  ;;  %s276_s11 = scalar_lea.vmem %s2291_s1, %s1248_s7  ;;  %s1654_s14 = scalar_lea.vmem %s2292_s2, %s1275_s8 }
  0x14   : > { %v300_v2 = vld [vmem:[%s1622_s28] sm:$0xff]  ;;  %359 = vperm.xlu1 %1399, %v308_v1   ;;  %v301_v4 = vld [vmem:[%s1622_s28 + $0x8] sm:$0xff]  ;;  %v302_v6 = vld [vmem:[%s1622_s28 + $0x10] sm:$0xff]  ;;  %s2241_s22 = scalar_lea.vmem %s2294_s4, %s1247_s25 }
  0x15   : > { %319 = vperm.xlu0 %1398, %v300_v2   ;;  %v311_v7 = vld [vmem:[%s1622_s28 + $0x58] sm:$0xff]  ;;  %v310_v8 = vld [vmem:[%s1622_s28 + $0x50] sm:$0xff]  ;;  %v305_v9 = vld [vmem:[%s1622_s28 + $0x28] sm:$0xff] }
  0x16   : > { %v304_v10 = vld [vmem:[%s1622_s28 + $0x20] sm:$0xff]  ;;  %v313_v11 = vld [vmem:[%s1622_s28 + $0x68] sm:$0xff]  ;;  %v307_v13 = vld [vmem:[%s1622_s28 + $0x38] sm:$0xff] }
  0x17   : > { %v312_v12 = vld [vmem:[%s1622_s28 + $0x60] sm:$0xff]  ;;  %v306_v14 = vld [vmem:[%s1622_s28 + $0x30] sm:$0xff]  ;;  %v315_v15 = vld [vmem:[%s1622_s28 + $0x78] sm:$0xff] }
  0x18   : > { %364 = vperm.xlu1 %1399, %v309_v3   ;;  %v314_v16 = vld [vmem:[%s1622_s28 + $0x70] sm:$0xff]  ;;  %v316_v21 = vld [vmem:[%s276_s11] sm:$0x3]  ;;  %v1663_v24 = vld [vmem:[%s1654_s14 + $0x8] sm:$0xff] }
  0x19   : > { %324 = vperm.xlu0 %1398, %v301_v4   ;;  %v1657_v22 = vld [vmem:[%s1654_s14] sm:$0xff]  ;;  %v1666_v25 = vld [vmem:[%s1654_s14 + $0x48] sm:$0xff]  ;;  %v1669_v26 = vld [vmem:[%s1654_s14 + $0x10] sm:$0xff]  ;;  %v1671_v27 = vrot.slane %v316_v21, %v400_v19  ;;  %v1673_v28 = vrot.slane %v316_v21, %v404_v20  ;;  %v554_v35 = vunpack.c.l.bf16 %v1663_v24  ;;  %v555_v38 = vunpack.c.h.bf16 %v1663_v24 }
  0x1a   : > { %v1660_v23 = vld [vmem:[%s1654_s14 + $0x40] sm:$0xff]  ;;  %v552_v29 = vunpack.c.l.bf16 %v1657_v22  ;;  %v1677_v30 = vld [vmem:[%s1654_s14 + $0x18] sm:$0xff]  ;;  %v1680_v31 = vld [vmem:[%s1654_s14 + $0x50] sm:$0xff]  ;;  %v553_v32 = vunpack.c.h.bf16 %v1657_v22  ;;  %v570_v39 = vunpack.c.l.bf16 %v1666_v25  ;;  %v571_v40 = vunpack.c.h.bf16 %v1666_v25 }
  0x1b   : > { %v568_v33 = vunpack.c.l.bf16 %v1660_v23  ;;  %v569_v34 = vunpack.c.h.bf16 %v1660_v23  ;;  %v1687_v36 = vld [vmem:[%s1654_s14 + $0x58] sm:$0xff]  ;;  %v1690_v37 = vld [vmem:[%s1654_s14 + $0x20] sm:$0xff]  ;;  %v556_v41 = vunpack.c.l.bf16 %v1669_v26  ;;  %v557_v42 = vunpack.c.h.bf16 %v1669_v26  ;;  %v1701_v46 = vld [vmem:[%s1654_s14 + $0x28] sm:$0xff] }
  0x1c   : > { %334 = vperm.xlu1 %1399, %v303_v5   ;;  %v558_v43 = vunpack.c.l.bf16 %v1677_v30  ;;  %v559_v44 = vunpack.c.h.bf16 %v1677_v30  ;;  %v572_v45 = vunpack.c.l.bf16 %v1680_v31  ;;  %v1704_v47 = vld [vmem:[%s1654_s14 + $0x60] sm:$0xff]  ;;  %v573_v50 = vunpack.c.h.bf16 %v1680_v31  ;;  %v1719_v62 = vld [vmem:[%s1654_s14 + $0x68] sm:$0xff]  ;;  %v1722_v63 = vld [vmem:[%s1654_s14 + $0x30] sm:$0xff] }
  0x1d   : > { %329 = vperm.xlu0 %1398, %v302_v6   ;;  %v574_v51 = vunpack.c.l.bf16 %v1687_v36  ;;  %v575_v52 = vunpack.c.h.bf16 %v1687_v36  ;;  %v1725_v0 = vld [vmem:[%s1654_s14 + $0x38] sm:$0xff] }
  0x20   : > { %374 = vperm.xlu1 %1399, %v311_v7  }
  0x21   : > { %369 = vperm.xlu0 %1398, %v310_v8  }
  0x24   : > { %344 = vperm.xlu1 %1399, %v305_v9  }
  0x25   : > { %339 = vperm.xlu0 %1398, %v304_v10  }
  0x28   : > { %384 = vperm.xlu1 %1399, %v313_v11   ;;  %v1732_v11 = vld [vmem:[%s1654_s14 + $0x70] sm:$0xff] }
  0x29   : > { %379 = vperm.xlu0 %1398, %v312_v12  }
  0x2c   : > { %354 = vperm.xlu1 %1399, %v307_v13  }
  0x2d   : > { %349 = vperm.xlu0 %1398, %v306_v14  }
  0x30   : > { %394 = vperm.xlu1 %1399, %v315_v15  }
  0x31   : > { %389 = vperm.xlu0 %1398, %v314_v16   ;;  %v1739_v16 = vld [vmem:[%s1654_s14 + $0x78] sm:$0xff] }
  0x8f   : > { %v360_v48 = vpop.permute.xlu1 %359 }
  0x90   : > { %v320_v49 = vpop.permute.xlu0 %319  ;;  %v424_v54 = vadd.f32 %v1671_v27, %v360_v48  ;;  %v425_v55 = vadd.f32 %v1673_v28, %v360_v48 }
  0x91   : > { %v408_v56 = vadd.f32 %v1671_v27, %v320_v49  ;;  %v409_v57 = vadd.f32 %v1673_v28, %v320_v49 }
  0x92   : > { %vm456_vm0 = vcmp.gt.f32.partialorder %v424_v54, 0.0  ;;  %vm457_vm1 = vcmp.gt.f32.partialorder %v425_v55, 0.0  ;;  %v488_v1 = vmul.f32 0.2, %v424_v54  ;;  %v489_v2 = vmul.f32 0.2, %v425_v55 }
  0x93   : > { %vm440_vm2 = vcmp.gt.f32.partialorder %v408_v56, 0.0  ;;  %vm441_vm3 = vcmp.gt.f32.partialorder %v409_v57, 0.0  ;;  %v472_v3 = vmul.f32 0.2, %v408_v56  ;;  %v473_v4 = vmul.f32 0.2, %v409_v57  ;;  %v365_v5 = vpop.permute.xlu1 %364 }
  0x94   : > { %v325_v6 = vpop.permute.xlu0 %324  ;;  %v520_v19 = vsel %vm456_vm0, %v424_v54, %v488_v1  ;;  %v521_v20 = vsel %vm457_vm1, %v425_v55, %v489_v2  ;;  %v426_v21 = vadd.f32 %v1671_v27, %v365_v5  ;;  %v427_v13 = vadd.f32 %v1673_v28, %v365_v5 }
  0x95   : > { %v410_v7 = vadd.f32 %v1671_v27, %v325_v6  ;;  %v411_v8 = vadd.f32 %v1673_v28, %v325_v6  ;;  %v504_v17 = vsel %vm440_vm2, %v408_v56, %v472_v3  ;;  %v505_v18 = vsel %vm441_vm3, %v409_v57, %v473_v4 }
  0x96   : > { %v1753_v54 = vadd.f32 %v552_v29, %v504_v17  ;;  %v1757_v55 = vadd.f32 %v553_v32, %v505_v18  ;;  %v1761_v1 = vadd.f32 %v568_v33, %v520_v19  ;;  %v1765_v2 = vadd.f32 %v569_v34, %v521_v20 }
  0x97   : > { %v335_v48 = vpop.permute.xlu1 %334  ;;  %v474_v12 = vmul.f32 0.2, %v410_v7  ;;  %v475_v56 = vmul.f32 0.2, %v411_v8  ;;  %vm442_vm4 = vcmp.gt.f32.partialorder %v410_v7, 0.0  ;;  %vm443_vm5 = vcmp.gt.f32.partialorder %v411_v8, 0.0 }
  0x98   : > { %v330_v49 = vpop.permute.xlu0 %329  ;;  %v1768_v3 = vadd.f32 %v1671_v27, %v335_v48  ;;  %v1771_v29 = vadd.f32 %v1673_v28, %v335_v48  ;;  %vm458_vm6 = vcmp.gt.f32.partialorder %v426_v21, 0.0  ;;  %vm459_vm7 = vcmp.gt.f32.partialorder %v427_v13, 0.0 }
  0x99   : > { %v412_v22 = vadd.f32 %v1671_v27, %v330_v49  ;;  %v413_v32 = vadd.f32 %v1673_v28, %v330_v49  ;;  %v490_v23 = vmul.f32 0.2, %v426_v21  ;;  %v491_v34 = vmul.f32 0.2, %v427_v13 }
  0x9a   : > { %v616_v17 = vmax.f32 %v1753_v54, %v1757_v55  ;;  %v506_v20 = vsel %vm442_vm4, %v410_v7, %v474_v12  ;;  %v507_v48 = vsel %vm443_vm5, %v411_v8, %v475_v56  ;;  %vm446_vm8 = vcmp.gt.f32.partialorder %v1768_v3, 0.0 }
  0x9b   : > { %v375_v4 = vpop.permute.xlu1 %374  ;;  %vm447_vm9 = vcmp.gt.f32.partialorder %v1771_v29, 0.0  ;;  %v478_v49 = vmul.f32 0.2, %v1768_v3  ;;  %v479_v5 = vmul.f32 0.2, %v1771_v29  ;;  %vm444_vm10 = vcmp.gt.f32.partialorder %v412_v22, 0.0 }
  0x9c   : > { %v370_v33 = vpop.permute.xlu0 %369  ;;  %v1779_v18 = vadd.f32 %v1671_v27, %v375_v4  ;;  %v1782_v19 = vadd.f32 %v1673_v28, %v375_v4  ;;  %617 = vmax.xlane.f32.xlu0 %v616_v17  ;;  %vm445_vm11 = vcmp.gt.f32.partialorder %v413_v32, 0.0  ;;  %v476_v4 = vmul.f32 0.2, %v412_v22 }
  0x9d   : > { %v428_v57 = vadd.f32 %v1671_v27, %v370_v33  ;;  %v1792_v15 = vadd.f32 %v1673_v28, %v370_v33  ;;  %v477_v7 = vmul.f32 0.2, %v413_v32  ;;  %v640_v56 = vmax.f32 %v1761_v1, %v1765_v2 }
  0x9e   : > { %v1798_v14 = vadd.f32 %v554_v35, %v506_v20  ;;  %v1802_v17 = vadd.f32 %v555_v38, %v507_v48  ;;  %vm462_vm12 = vcmp.gt.f32.partialorder %v1779_v18, 0.0  ;;  %vm463_vm13 = vcmp.gt.f32.partialorder %v1782_v19, 0.0 }
  0x9f   : > { %v345_v12 = vpop.permute.xlu1 %344  ;;  %v494_v6 = vmul.f32 0.2, %v1779_v18  ;;  %v495_v10 = vmul.f32 0.2, %v1782_v19  ;;  %v522_v9 = vsel %vm458_vm6, %v426_v21, %v490_v23  ;;  %v523_v35 = vsel %vm459_vm7, %v427_v13, %v491_v34 }
  0xa0   : > { %v340_v8 = vpop.permute.xlu0 %339  ;;  %v1805_v33 = vadd.f32 %v1671_v27, %v345_v12  ;;  %vm460_vm14 = vcmp.gt.f32.partialorder %v428_v57, 0.0  ;;  %vm461_vm15 = vcmp.gt.f32.partialorder %v1792_v15, 0.0  ;;  %v492_v24 = vmul.f32 0.2, %v428_v57  ;;  %641 = vmax.xlane.f32.xlu0 %v640_v56 }
  0xa1   : > { %v619_v38 = vmax.f32 %v1798_v14, %v1802_v17  ;;  %v493_v20 = vmul.f32 0.2, %v1792_v15  ;;  %v1818_v48 = vadd.f32 %v1673_v28, %v345_v12  ;;  %v1821_v61 = vadd.f32 %v1671_v27, %v340_v8 }
  0xa2   : > { %v1824_v21 = vadd.f32 %v1673_v28, %v340_v8  ;;  %v1827_v34 = vmul.f32 0.2, %v1805_v33  ;;  %v1831_v56 = vadd.f32 %v570_v39, %v522_v9  ;;  %v1835_v12 = vadd.f32 %v571_v40, %v523_v35 }
  0xa3   : > { %v385_v13 = vpop.permute.xlu1 %384  ;;  %620 = vmax.xlane.f32.xlu1 %v619_v38  ;;  %v508_v60 = vsel %vm444_vm10, %v412_v22, %v476_v4  ;;  %v509_v59 = vsel %vm445_vm11, %v413_v32, %v477_v7  ;;  %vm448_vm0 = vcmp.gt.f32.partialorder %v1821_v61, 0.0  ;;  %vm450_vm2 = vcmp.gt.f32.partialorder %v1805_v33, 0.0 }
  0xa4   : > { %v380_v23 = vpop.permute.xlu0 %379  ;;  %v1841_v8 = vadd.f32 %v556_v41, %v508_v60  ;;  %v1844_v38 = vadd.f32 %v1671_v27, %v385_v13  ;;  %v1847_v58 = vadd.f32 %v1673_v28, %v385_v13  ;;  %v643_v39 = vmax.f32 %v1831_v56, %v1835_v12 }
  0xa5   : > { %v1853_v25 = vadd.f32 %v557_v42, %v509_v59  ;;  %v1856_v40 = vadd.f32 %v1671_v27, %v380_v23  ;;  %v1859_v9 = vadd.f32 %v1673_v28, %v380_v23  ;;  %v1862_v41 = vmul.f32 0.2, %v1818_v48 }
  0xa6   : > { %vm449_vm1 = vcmp.gt.f32.partialorder %v1824_v21, 0.0  ;;  %v480_v60 = vmul.f32 0.2, %v1821_v61  ;;  %v481_v26 = vmul.f32 0.2, %v1824_v21  ;;  %644 = vmax.xlane.f32.xlu0 %v643_v39  ;;  %vm451_vm3 = vcmp.gt.f32.partialorder %v1818_v48, 0.0 }
  0xa7   : > { %v355_v22 = vpop.permute.xlu1 %354  ;;  %v622_v42 = vmax.f32 %v1841_v8, %v1853_v25  ;;  %v1871_v59 = vmul.f32 0.2, %v1844_v38  ;;  %v1874_v32 = vmul.f32 0.2, %v1847_v58  ;;  %vm464_vm4 = vcmp.gt.f32.partialorder %v1856_v40, 0.0 }
  0xa8   : > { %v350_v4 = vpop.permute.xlu0 %349  ;;  %v496_v7 = vmul.f32 0.2, %v1856_v40  ;;  %v510_v35 = vsel %vm446_vm8, %v1768_v3, %v478_v49  ;;  %v511_v13 = vsel %vm447_vm9, %v1771_v29, %v479_v5  ;;  %v524_v23 = vsel %vm460_vm14, %v428_v57, %v492_v24 }
  0xa9   : > { %623 = vmax.xlane.f32.xlu1 %v622_v42  ;;  %vm465_vm5 = vcmp.gt.f32.partialorder %v1859_v9, 0.0  ;;  %v1890_v39 = vadd.f32 %v558_v43, %v510_v35  ;;  %v1894_v53 = vadd.f32 %v559_v44, %v511_v13  ;;  %v525_v3 = vsel %vm461_vm15, %v1792_v15, %v493_v20 }
  0xaa   : > { %v1901_v29 = vadd.f32 %v572_v45, %v524_v23  ;;  %vm466_vm6 = vcmp.gt.f32.partialorder %v1844_v38, 0.0  ;;  %vm467_vm7 = vcmp.gt.f32.partialorder %v1847_v58, 0.0  ;;  %v1907_v43 = vadd.f32 %v573_v50, %v525_v3 }
  0xab   : > { %v422_v30 = vadd.f32 %v1671_v27, %v355_v22  ;;  %v1911_v44 = vadd.f32 %v1673_v28, %v355_v22  ;;  %v420_v57 = vadd.f32 %v1671_v27, %v350_v4  ;;  %v625_v15 = vmax.f32 %v1890_v39, %v1894_v53  ;;  %v395_v20 = vpop.permute.xlu1 %394 }
  0xac   : > { %v421_v45 = vadd.f32 %v1673_v28, %v350_v4  ;;  %v526_v5 = vsel %vm462_vm12, %v1779_v18, %v494_v6  ;;  %v527_v31 = vsel %vm463_vm13, %v1782_v19, %v495_v10  ;;  %v497_v50 = vmul.f32 0.2, %v1859_v9  ;;  %v390_v18 = vpop.permute.xlu0 %389 }
  0xad   : > { %v646_v49 = vmax.f32 %v1901_v29, %v1907_v43  ;;  %vm454_vm8 = vcmp.gt.f32.partialorder %v422_v30, 0.0  ;;  %v486_v24 = vmul.f32 0.2, %v422_v30  ;;  %626 = vmax.xlane.f32.xlu0 %v625_v15  ;;  %vm455_vm9 = vcmp.gt.f32.partialorder %v1911_v44, 0.0 }
  0xae   : > { %v487_v22 = vmul.f32 0.2, %v1911_v44  ;;  %vm452_vm10 = vcmp.gt.f32.partialorder %v420_v57, 0.0  ;;  %vm453_vm11 = vcmp.gt.f32.partialorder %v421_v45, 0.0  ;;  %v484_v6 = vmul.f32 0.2, %v420_v57 }
  0xaf   : > { %647 = vmax.xlane.f32.xlu1 %v646_v49  ;;  %v485_v42 = vmul.f32 0.2, %v421_v45  ;;  %v1930_v10 = vadd.f32 %v574_v51, %v526_v5  ;;  %v1934_v19 = vadd.f32 %v575_v52, %v527_v31  ;;  %v512_v4 = vsel %vm448_vm0, %v1821_v61, %v480_v60 }
  0xb0   : > { %v513_v35 = vsel %vm449_vm1, %v1824_v21, %v481_v26  ;;  %v2295_v13 = vunpack.c.l.bf16 %v1690_v37  ;;  %v438_v3 = vadd.f32 %v1671_v27, %v395_v20  ;;  %v439_v51 = vadd.f32 %v1673_v28, %v395_v20 }
  0xb1   : > { %v649_v36 = vmax.f32 %v1930_v10, %v1934_v19  ;;  %v2296_v52 = vunpack.c.h.bf16 %v1690_v37  ;;  %v436_v61 = vadd.f32 %v1671_v27, %v390_v18  ;;  %v437_v60 = vadd.f32 %v1673_v28, %v390_v18 }
  0xb2   : > { %v1944_v23 = vadd.f32 %v2295_v13, %v512_v4  ;;  %vm470_vm12 = vcmp.gt.f32.partialorder %v438_v3, 0.0  ;;  %vm471_vm13 = vcmp.gt.f32.partialorder %v439_v51, 0.0  ;;  %v502_v21 = vmul.f32 0.2, %v438_v3 }
  0xb3   : > { %v1952_v15 = vadd.f32 %v2296_v52, %v513_v35  ;;  %v503_v26 = vmul.f32 0.2, %v439_v51  ;;  %650 = vmax.xlane.f32.xlu0 %v649_v36  ;;  %vm468_vm14 = vcmp.gt.f32.partialorder %v436_v61, 0.0  ;;  %vm469_vm15 = vcmp.gt.f32.partialorder %v437_v60, 0.0 }
  0xb4   : > { %v500_v31 = vmul.f32 0.2, %v436_v61  ;;  %v501_v49 = vmul.f32 0.2, %v437_v60  ;;  %v514_v37 = vsel %vm450_vm2, %v1805_v33, %v1827_v34  ;;  %v515_v27 = vsel %vm451_vm3, %v1818_v48, %v1862_v41 }
  0xb5   : > { %v628_v5 = vmax.f32 %v1944_v23, %v1952_v15  ;;  %v528_v28 = vsel %vm464_vm4, %v1856_v40, %v496_v7  ;;  %v2297_v20 = vunpack.c.l.bf16 %v1701_v46  ;;  %v2298_v4 = vunpack.c.h.bf16 %v1701_v46 }
  0xb6   : > { %v529_v33 = vsel %vm465_vm5, %v1859_v9, %v497_v50  ;;  %v2299_v34 = vunpack.c.l.bf16 %v1704_v47  ;;  %v2300_v41 = vunpack.c.h.bf16 %v1704_v47  ;;  %v530_v7 = vsel %vm466_vm6, %v1844_v38, %v1871_v59 }
  0xb7   : > { %629 = vmax.xlane.f32.xlu1 %v628_v5  ;;  %v1971_v18 = vadd.f32 %v2297_v20, %v514_v37  ;;  %v1975_v35 = vadd.f32 %v2298_v4, %v515_v27  ;;  %v531_v46 = vsel %vm467_vm7, %v1847_v58, %v1874_v32  ;;  %v516_v9 = vsel %vm452_vm10, %v420_v57, %v484_v6 }
  0xb8   : > { %v1982_v48 = vadd.f32 %v2299_v34, %v528_v28  ;;  %v1986_v40 = vadd.f32 %v2300_v41, %v529_v33  ;;  %v2301_v13 = vunpack.c.l.bf16 %v1719_v62  ;;  %v2302_v36 = vunpack.c.h.bf16 %v1719_v62  ;;  %v1403_v34 = vld [vmem:[%s1632_s6 + $0x30] sm:$0xff]   ;;  %v1404_v41 = vld [vmem:[%s1632_s6 + $0x68] sm:$0xff]  }
  0xb9   : > { %v631_v50 = vmax.f32 %v1971_v18, %v1975_v35  ;;  %v517_v38 = vsel %vm453_vm11, %v421_v45, %v485_v42  ;;  %v2303_v58 = vunpack.c.l.bf16 %v1722_v63  ;;  %v2304_v57 = vunpack.c.h.bf16 %v1722_v63 }
  0xba   : > { %v2001_v47 = vadd.f32 %v2301_v13, %v530_v7  ;;  %v2005_v52 = vadd.f32 %v2302_v36, %v531_v46  ;;  %v652_v59 = vmax.f32 %v1982_v48, %v1986_v40  ;;  %v518_v5 = vsel %vm454_vm8, %v422_v30, %v486_v24 }
  0xbb   : > { %v2012_v32 = vadd.f32 %v2303_v58, %v516_v9  ;;  %v2016_v6 = vadd.f32 %v2304_v57, %v517_v38  ;;  %632 = vmax.xlane.f32.xlu0 %v631_v50  ;;  %v519_v62 = vsel %vm455_vm9, %v1911_v44, %v487_v22  ;;  %v2305_v45 = vunpack.c.l.bf16 %v1725_v0 }
  0xbc   : > { %v532_v37 = vsel %vm468_vm14, %v436_v61, %v500_v31  ;;  %653 = vmax.xlane.f32.xlu1 %v652_v59  ;;  %v2306_v63 = vunpack.c.h.bf16 %v1725_v0  ;;  %v533_v30 = vsel %vm469_vm15, %v437_v60, %v501_v49  ;;  %v2307_v24 = vunpack.c.l.bf16 %v1732_v11 }
  0xbd   : > { %v2024_v42 = vadd.f32 %v2305_v45, %v518_v5  ;;  %v634_v27 = vmax.f32 %v2012_v32, %v2016_v6  ;;  %v655_v22 = vmax.f32 %v2001_v47, %v2005_v52  ;;  %v2308_v61 = vunpack.c.h.bf16 %v1732_v11 }
  0xbe   : > { %v2031_v28 = vadd.f32 %v2306_v63, %v519_v62  ;;  %v2036_v44 = vadd.f32 %v2307_v24, %v532_v37  ;;  %v534_v0 = vsel %vm470_vm12, %v438_v3, %v502_v21  ;;  %v535_v20 = vsel %vm471_vm13, %v439_v51, %v503_v26  ;;  %v1400_v21 = vld [vmem:[%s1632_s6 + $0x78] sm:$0xff]   ;;  %v1402_v26 = vld [vmem:[%s1632_s6 + $0x70] sm:$0xff]  }
  0xbf   : > { %v2042_v31 = vadd.f32 %v2308_v61, %v533_v30  ;;  %v2309_v60 = vunpack.c.l.bf16 %v1739_v16  ;;  %v2310_v4 = vunpack.c.h.bf16 %v1739_v16  ;;  %656 = vmax.xlane.f32.xlu0 %v655_v22  ;;  %v1401_v16 = vld [vmem:[%s1632_s6 + $0x38] sm:$0xff]   ;;  %1277 = vmatprep.subr.bf16.mxu0 %v1400_v21  ;;  %vm1097_vm0 = vcmask 64512  }
  0xc0   : > { %635 = vmax.xlane.f32.xlu1 %v634_v27  ;;  %v637_v3 = vmax.f32 %v2024_v42, %v2031_v28  ;;  %1341 = vmatprep.subr.bf16.mxu1 %v1400_v21 }
  0xc1   : > { %v2048_v49 = vadd.f32 %v2309_v60, %v534_v0  ;;  %v2052_v33 = vadd.f32 %v2310_v4, %v535_v20  ;;  %v658_v11 = vmax.f32 %v2036_v44, %v2042_v31  ;;  %1278 = vmatpush3.bf16.msra.mxu0 %v1401_v16  ;;  %1349 = vmatpush3.bf16.msra.mxu1 %v1401_v16 }
  0xc2   : > { %1279 = vmatprep.subr.bf16.mxu0 %v1402_v26  ;;  %1342 = vmatprep.subr.bf16.mxu1 %v1402_v26 }
  0xc3   : > { %638 = vmax.xlane.f32.xlu0 %v637_v3  ;;  %v661_v51 = vmax.f32 %v2048_v49, %v2052_v33 }
  0xc4   : > { %659 = vmax.xlane.f32.xlu1 %v658_v11 }
  0xc5   : > { %1280 = vmatpush3.bf16.msra.mxu0 %v1403_v34  ;;  %1350 = vmatpush3.bf16.msra.mxu1 %v1403_v34 }
  0xc6   : > { %1281 = vmatprep.subr.bf16.mxu0 %v1404_v41  ;;  %1343 = vmatprep.subr.bf16.mxu1 %v1404_v41 }
  0xc7   : > { %662 = vmax.xlane.f32.xlu0 %v661_v51 }
 0x125   : > { %v618_v7 = vpop.xlane.xlu0 %617 }
 0x126   : > { %v664_v46 = vsub.f32 %v1753_v54, %v618_v7  ;;  %v665_v9 = vsub.f32 %v1757_v55, %v618_v7 }
 0x128   : > { %v696_v50 = vmul.f32 1.442695, %v664_v46  ;;  %v698_v13 = vmul.f32 1.442695, %v665_v9 }
 0x129   : > { %v642_v36 = vpop.xlane.xlu0 %641 }
 0x12a   : > { %1416 = vpow2.f32 %v696_v50  ;;  %v680_v38 = vsub.f32 %v1761_v1, %v642_v36  ;;  %v681_v59 = vsub.f32 %v1765_v2, %v642_v36 }
 0x12b   : > { %1418 = vpow2.f32 %v698_v13 }
 0x12c   : > { %v621_v58 = vpop.xlane.xlu1 %620  ;;  %v728_v62 = vmul.f32 1.442695, %v680_v38  ;;  %v730_v45 = vmul.f32 1.442695, %v681_v59 }
 0x12d   : > { %v666_v57 = vsub.f32 %v1798_v14, %v621_v58  ;;  %v667_v5 = vsub.f32 %v1802_v17, %v621_v58 }
 0x12e   : > { %1420 = vpow2.f32 %v728_v62 }
 0x12f   : > { %v700_v37 = vmul.f32 1.442695, %v666_v57  ;;  %v702_v54 = vmul.f32 1.442695, %v667_v5  ;;  %1422 = vpow2.f32 %v730_v45  ;;  %v645_v55 = vpop.xlane.xlu0 %644 }
 0x130   : > { %v682_v27 = vsub.f32 %v1831_v56, %v645_v55  ;;  %v683_v1 = vsub.f32 %v1835_v12, %v645_v55 }
 0x131   : > { %1424 = vpow2.f32 %v700_v37 }
 0x132   : > { %1426 = vpow2.f32 %v702_v54  ;;  %v624_v2 = vpop.xlane.xlu1 %623  ;;  %v732_v30 = vmul.f32 1.442695, %v682_v27  ;;  %v734_v17 = vmul.f32 1.442695, %v683_v1 }
 0x133   : > { %v668_v63 = vsub.f32 %v1841_v8, %v624_v2  ;;  %v669_v14 = vsub.f32 %v1853_v25, %v624_v2 }
 0x134   : > { %1428 = vpow2.f32 %v732_v30  ;;  %v1406_v30 = vld [vmem:[%s1632_s6 + $0x60] sm:$0xff]  }
 0x135   : > { %v704_v24 = vmul.f32 1.442695, %v668_v63  ;;  %v706_v22 = vmul.f32 1.442695, %v669_v14  ;;  %1430 = vpow2.f32 %v734_v17  ;;  %v1405_v14 = vld [vmem:[%s1632_s6 + $0x28] sm:$0xff]  }
 0x136   : > { %v627_v61 = vpop.xlane.xlu0 %626  ;;  %1282 = vmatpush3.bf16.msra.mxu0 %v1405_v14  ;;  %1351 = vmatpush3.bf16.msra.mxu1 %v1405_v14 }
 0x137   : > { %1432 = vpow2.f32 %v704_v24  ;;  %v670_v20 = vsub.f32 %v1890_v39, %v627_v61  ;;  %v671_v56 = vsub.f32 %v1894_v53, %v627_v61  ;;  %v2077_v12 = vpop.eup %1416  ;;  %1283 = vmatprep.subr.bf16.mxu0 %v1406_v30  ;;  %1344 = vmatprep.subr.bf16.mxu1 %v1406_v30 }
 0x138   : > { %v648_v0 = vpop.xlane.xlu1 %647  ;;  %1434 = vpow2.f32 %v706_v22  ;;  %v2081_v60 = vpop.eup %1418 }
 0x139   : > { %v684_v8 = vsub.f32 %v1901_v29, %v648_v0  ;;  %v685_v25 = vsub.f32 %v1907_v43, %v648_v0  ;;  %v708_v4 = vmul.f32 1.442695, %v670_v20  ;;  %v710_v51 = vmul.f32 1.442695, %v671_v56 }
 0x13a   : > { %v760_v21 = vadd.f32 %v2081_v60, %v2077_v12 }
 0x13b   : > { %v736_v11 = vmul.f32 1.442695, %v684_v8  ;;  %v738_v3 = vmul.f32 1.442695, %v685_v25  ;;  %1436 = vpow2.f32 %v708_v4  ;;  %v2085_v16 = vpop.eup %1420 }
 0x13c   : > { %v651_v39 = vpop.xlane.xlu0 %650  ;;  %761 = vadd.xlane.f32.xlu1 %v760_v21  ;;  %v2089_v43 = vpop.eup %1422 }
 0x13d   : > { %1438 = vpow2.f32 %v736_v11  ;;  %v686_v53 = vsub.f32 %v1930_v10, %v651_v39  ;;  %v687_v29 = vsub.f32 %v1934_v19, %v651_v39  ;;  %v784_v10 = vadd.f32 %v2089_v43, %v2085_v16 }
 0x13e   : > { %1440 = vpow2.f32 %v738_v3  ;;  %v2091_v34 = vpop.eup %1424 }
 0x13f   : > { %1442 = vpow2.f32 %v710_v51  ;;  %v740_v46 = vmul.f32 1.442695, %v686_v53  ;;  %v2095_v9 = vpop.eup %1426  ;;  %v742_v50 = vmul.f32 1.442695, %v687_v29  ;;  %v1407_v53 = vld [vmem:[%s1632_s6 + $0x20] sm:$0xff]  }
 0x140   : > { %v630_v26 = vpop.xlane.xlu1 %629  ;;  %v763_v36 = vadd.f32 %v2095_v9, %v2091_v34  ;;  %785 = vadd.xlane.f32.xlu1 %v784_v10  ;;  %1284 = vmatpush3.bf16.msra.mxu0 %v1407_v53 }
 0x141   : > { %v672_v41 = vsub.f32 %v1944_v23, %v630_v26  ;;  %v673_v7 = vsub.f32 %v1952_v15, %v630_v26  ;;  %1444 = vpow2.f32 %v740_v46  ;;  %v2101_v59 = vpop.eup %1428  ;;  %1352 = vmatpush3.bf16.msra.mxu1 %v1407_v53 }
 0x142   : > { %1446 = vpow2.f32 %v742_v50  ;;  %764 = vadd.xlane.f32.xlu0 %v763_v36  ;;  %v2105_v57 = vpop.eup %1430 }
 0x143   : > { %v712_v19 = vmul.f32 1.442695, %v672_v41  ;;  %v714_v13 = vmul.f32 1.442695, %v673_v7  ;;  %v787_v54 = vadd.f32 %v2105_v57, %v2101_v59 }
 0x144   : > { %v633_v38 = vpop.xlane.xlu0 %632  ;;  %v2109_v45 = vpop.eup %1432 }
 0x145   : > { %1448 = vpow2.f32 %v712_v19  ;;  %v654_v23 = vpop.xlane.xlu1 %653  ;;  %v674_v15 = vsub.f32 %v1971_v18, %v633_v38  ;;  %v675_v58 = vsub.f32 %v1975_v35, %v633_v38  ;;  %v2113_v55 = vpop.eup %1434  ;;  %v1410_v38 = vld [vmem:[%s1632_s6 + $0x50] sm:$0xff]  }
 0x146   : > { %1450 = vpow2.f32 %v714_v13  ;;  %v688_v5 = vsub.f32 %v1982_v48, %v654_v23  ;;  %v689_v62 = vsub.f32 %v1986_v40, %v654_v23  ;;  %v766_v40 = vadd.f32 %v2113_v55, %v2109_v45  ;;  %788 = vadd.xlane.f32.xlu0 %v787_v54 }
 0x147   : > { %v716_v37 = vmul.f32 1.442695, %v674_v15  ;;  %v718_v27 = vmul.f32 1.442695, %v675_v58 }
 0x148   : > { %v744_v18 = vmul.f32 1.442695, %v688_v5  ;;  %v746_v35 = vmul.f32 1.442695, %v689_v62  ;;  %v657_v1 = vpop.xlane.xlu0 %656  ;;  %v2123_v22 = vpop.eup %1436  ;;  %767 = vadd.xlane.f32.xlu1 %v766_v40 }
 0x149   : > { %1452 = vpow2.f32 %v716_v37  ;;  %v636_v2 = vpop.xlane.xlu1 %635  ;;  %v690_v48 = vsub.f32 %v2001_v47, %v657_v1  ;;  %v691_v63 = vsub.f32 %v2005_v52, %v657_v1 }
 0x14a   : > { %1454 = vpow2.f32 %v744_v18  ;;  %v676_v17 = vsub.f32 %v2012_v32, %v636_v2  ;;  %v677_v24 = vsub.f32 %v2016_v6, %v636_v2  ;;  %v2125_v47 = vpop.eup %1438 }
 0x14b   : > { %1456 = vpow2.f32 %v746_v35  ;;  %v748_v61 = vmul.f32 1.442695, %v690_v48  ;;  %v750_v20 = vmul.f32 1.442695, %v691_v63  ;;  %v2127_v32 = vpop.eup %1440  ;;  %v1411_v35 = vld [vmem:[%s1632_s6 + $0x10] sm:$0xff]  }
 0x14c   : > { %1458 = vpow2.f32 %v718_v27  ;;  %v720_v52 = vmul.f32 1.442695, %v676_v17  ;;  %v722_v0 = vmul.f32 1.442695, %v677_v24  ;;  %v639_v56 = vpop.xlane.xlu0 %638  ;;  %v2131_v4 = vpop.eup %1442  ;;  %v790_v51 = vadd.f32 %v2127_v32, %v2125_v47  ;;  %v1412_v27 = vld [vmem:[%s1632_s6 + $0x48] sm:$0xff]   ;;  %v1414_v24 = vld [vmem:[%s1632_s6 + $0x40] sm:$0xff]  }
 0x14d   : > { %1460 = vpow2.f32 %v748_v61  ;;  %v660_v6 = vpop.xlane.xlu1 %659  ;;  %v678_v8 = vsub.f32 %v2024_v42, %v639_v56  ;;  %v679_v25 = vsub.f32 %v2031_v28, %v639_v56  ;;  %v769_v39 = vadd.f32 %v2131_v4, %v2123_v22  ;;  %v1408_v42 = vld [vmem:[%s1632_s6 + $0x58] sm:$0xff]   ;;  %v1413_v17 = vld [vmem:[%s1632_s6 + $0x8] sm:$0xff]  }
 0x14e   : > { %1462 = vpow2.f32 %v720_v52  ;;  %v692_v11 = vsub.f32 %v2036_v44, %v660_v6  ;;  %v693_v3 = vsub.f32 %v2042_v31, %v660_v6  ;;  %v2141_v29 = vpop.eup %1444  ;;  %791 = vadd.xlane.f32.xlu1 %v790_v51  ;;  %1285 = vmatprep.subr.bf16.mxu0 %v1408_v42 }
 0x14f   : > { %1464 = vpow2.f32 %v722_v0  ;;  %v724_v21 = vmul.f32 1.442695, %v678_v8  ;;  %v726_v41 = vmul.f32 1.442695, %v679_v25  ;;  %v2143_v44 = vpop.eup %1446  ;;  %770 = vadd.xlane.f32.xlu0 %v769_v39  ;;  %1345 = vmatprep.subr.bf16.mxu1 %v1408_v42  ;;  %v1415_v8 = vld [vmem:[%s1632_s6] sm:$0xff]  }
 0x150   : > { %1466 = vpow2.f32 %v750_v20  ;;  %v752_v28 = vmul.f32 1.442695, %v692_v11  ;;  %v754_v26 = vmul.f32 1.442695, %v693_v3  ;;  %v663_v7 = vpop.xlane.xlu0 %662  ;;  %v793_v10 = vadd.f32 %v2143_v44, %v2141_v29 }
 0x151   : > { %1468 = vpow2.f32 %v724_v21  ;;  %v694_v31 = vsub.f32 %v2048_v49, %v663_v7  ;;  %v695_v46 = vsub.f32 %v2052_v33, %v663_v7  ;;  %v1409_v33 = vld [vmem:[%s1632_s6 + $0x18] sm:$0xff]  }
 0x152   : > { %v2147_v50 = vpop.eup %1448  ;;  %1470 = vpow2.f32 %v752_v28  ;;  %1286 = vmatpush3.bf16.msra.mxu0 %v1409_v33  ;;  %1353 = vmatpush3.bf16.msra.mxu1 %v1409_v33 }
 0x153   : > { %v2151_v19 = vpop.eup %1450  ;;  %1472 = vpow2.f32 %v754_v26  ;;  %v756_v13 = vmul.f32 1.442695, %v694_v31  ;;  %v758_v36 = vmul.f32 1.442695, %v695_v46  ;;  %794 = vadd.xlane.f32.xlu0 %v793_v10  ;;  %1287 = vmatprep.subr.bf16.mxu0 %v1410_v38 }
 0x154   : > { %1474 = vpow2.f32 %v726_v41  ;;  %v772_v49 = vadd.f32 %v2151_v19, %v2147_v50  ;;  %1346 = vmatprep.subr.bf16.mxu1 %v1410_v38 }
 0x155   : > { %1476 = vpow2.f32 %v756_v13 }
 0x156   : > { %v2157_v23 = vpop.eup %1452  ;;  %1478 = vpow2.f32 %v758_v36  ;;  %773 = vadd.xlane.f32.xlu1 %v772_v49  ;;  %1288 = vmatpush3.bf16.msra.mxu0 %v1411_v35 }
 0x157   : > { %v2159_v15 = vpop.eup %1454  ;;  %1354 = vmatpush3.bf16.msra.mxu1 %v1411_v35  ;;  %1289 = vmatprep.subr.bf16.mxu0 %v1412_v27 }
 0x158   : > { %v2161_v58 = vpop.eup %1456  ;;  %1347 = vmatprep.subr.bf16.mxu1 %v1412_v27 }
 0x159   : > { %v2163_v5 = vpop.eup %1458  ;;  %v796_v62 = vadd.f32 %v2161_v58, %v2159_v15 }
 0x15a   : > { %v2167_v37 = vpop.eup %1460  ;;  %v775_v54 = vadd.f32 %v2163_v5, %v2157_v23  ;;  %1290 = vmatpush3.bf16.msra.mxu0 %v1413_v17 }
 0x15b   : > { %v2171_v18 = vpop.eup %1462  ;;  %797 = vadd.xlane.f32.xlu1 %v796_v62  ;;  %1355 = vmatpush3.bf16.msra.mxu1 %v1413_v17 }
 0x15c   : > { %v2175_v1 = vpop.eup %1464  ;;  %776 = vadd.xlane.f32.xlu0 %v775_v54  ;;  %1291 = vmatprep.subr.bf16.mxu0 %v1414_v24 }
 0x15d   : > { %v2177_v2 = vpop.eup %1466  ;;  %v778_v48 = vadd.f32 %v2175_v1, %v2171_v18  ;;  %1348 = vmatprep.subr.bf16.mxu1 %v1414_v24 }
 0x15e   : > { %v2181_v63 = vpop.eup %1468  ;;  %v799_v40 = vadd.f32 %v2177_v2, %v2167_v37  ;;  %1292 = vmatpush3.bf16.msra.mxu0 %v1415_v8 }
 0x15f   : > { %v2185_v14 = vpop.eup %1470  ;;  %779 = vadd.xlane.f32.xlu1 %v778_v48  ;;  %1356 = vmatpush3.bf16.msra.mxu1 %v1415_v8 }
 0x160   : > { %v2187_v30 = vpop.eup %1472  ;;  %800 = vadd.xlane.f32.xlu0 %v799_v40 }
 0x161   : > { %v2191_v61 = vpop.eup %1474  ;;  %v802_v52 = vadd.f32 %v2187_v30, %v2185_v14 }
 0x162   : > { %v2195_v0 = vpop.eup %1476  ;;  %v781_v20 = vadd.f32 %v2191_v61, %v2181_v63 }
 0x163   : > { %v2199_v56 = vpop.eup %1478  ;;  %803 = vadd.xlane.f32.xlu1 %v802_v52 }
 0x164   : > { %782 = vadd.xlane.f32.xlu0 %v781_v20  ;;  %v805_v6 = vadd.f32 %v2199_v56, %v2195_v0 }
 0x168   : > { %806 = vadd.xlane.f32.xlu0 %v805_v6 }
 0x1c5   : > { %v762_v25 = vpop.xlane.xlu1 %761 }
 0x1c6   : > { %1480 = vrcp.f32 %v762_v25 }
 0x1c9   : > { %v786_v11 = vpop.xlane.xlu1 %785 }
 0x1cb   : > { %v765_v3 = vpop.xlane.xlu0 %764 }
 0x1cc   : > { %1482 = vrcp.f32 %v765_v3 }
 0x1cd   : > { %1484 = vrcp.f32 %v786_v11 }
 0x1cf   : > { %v789_v51 = vpop.xlane.xlu0 %788 }
 0x1d0   : > { %1486 = vrcp.f32 %v789_v51 }
 0x1d1   : > { %v768_v21 = vpop.xlane.xlu1 %767 }
 0x1d2   : > { %1488 = vrcp.f32 %v768_v21 }
 0x1d3   : > { %v1481_v39 = vpop.eup %1480 }
 0x1d4   : > { %v825_v26 = vmul.f32 %v1481_v39, %v2081_v60  ;;  %v824_v7 = vmul.f32 %v1481_v39, %v2077_v12 }
 0x1d7   : > { %v792_v53 = vpop.xlane.xlu1 %791 }
 0x1d8   : > { %v771_v42 = vpop.xlane.xlu0 %770 }
 0x1d9   : > { %1490 = vrcp.f32 %v771_v42  ;;  %v1483_v28 = vpop.eup %1482 }
 0x1da   : > { %1492 = vrcp.f32 %v792_v53  ;;  %v827_v41 = vmul.f32 %v1483_v28, %v2095_v9  ;;  %v826_v31 = vmul.f32 %v1483_v28, %v2091_v34  ;;  %v1485_v46 = vpop.eup %1484 }
 0x1db   : > { %v841_v38 = vmul.f32 %v1485_v46, %v2089_v43  ;;  %v840_v60 = vmul.f32 %v1485_v46, %v2085_v16 }
 0x1dc   : > { %v795_v10 = vpop.xlane.xlu0 %794  ;;  %v857_v36 = vpack.c.bf16 %v827_v41, %v825_v26  ;;  %v856_v49 = vpack.c.bf16 %v826_v31, %v824_v7 }
 0x1dd   : > { %1494 = vrcp.f32 %v795_v10  ;;  %v1487_v33 = vpop.eup %1486 }
 0x1de   : > { %1032 = vmatprep.mubr.bf16.mxu0 %v857_v36  ;;  %v843_v62 = vmul.f32 %v1487_v33, %v2105_v57  ;;  %v842_v9 = vmul.f32 %v1487_v33, %v2101_v59 }
 0x1df   : > { %v774_v13 = vpop.xlane.xlu1 %773  ;;  %1033 = vmatmul.mubr.bf16.vlgmr.msra.gmra.mxu0 %v856_v49  ;;  %v1489_v27 = vpop.eup %1488 }
 0x1e0   : > { %v865_v12 = vpack.c.bf16 %v843_v62, %v841_v38  ;;  %v864_v54 = vpack.c.bf16 %v842_v9, %v840_v60  ;;  %1496 = vrcp.f32 %v774_v13  ;;  %v829_v57 = vmul.f32 %v1489_v27, %v2113_v55 }
 0x1e1   : > { %v828_v59 = vmul.f32 %v1489_v27, %v2109_v45 }
 0x1e2   : > { %1064 = vmatprep.mubr.bf16.mxu1 %v865_v12 }
 0x1e3   : > { %1065 = vmatmul.mubr.bf16.vlgmr.msra.gmra.mxu1 %v864_v54 }
 0x1e4   : > { %v798_v34 = vpop.xlane.xlu1 %797 }
 0x1e5   : > { %v777_v35 = vpop.xlane.xlu0 %776 }
 0x1e6   : > { %1498 = vrcp.f32 %v777_v35  ;;  %v1491_v48 = vpop.eup %1490 }
 0x1e7   : > { %1500 = vrcp.f32 %v798_v34  ;;  %v831_v16 = vmul.f32 %v1491_v48, %v2131_v4  ;;  %v830_v17 = vmul.f32 %v1491_v48, %v2123_v22  ;;  %v1493_v24 = vpop.eup %1492 }
 0x1e8   : > { %v780_v40 = vpop.xlane.xlu1 %779  ;;  %v845_v11 = vmul.f32 %v1493_v24, %v2127_v32  ;;  %v844_v55 = vmul.f32 %v1493_v24, %v2125_v47 }
 0x1e9   : > { %v801_v43 = vpop.xlane.xlu0 %800  ;;  %v859_v52 = vpack.c.bf16 %v831_v16, %v829_v57  ;;  %v858_v20 = vpack.c.bf16 %v830_v17, %v828_v59 }
 0x1ea   : > { %1502 = vrcp.f32 %v801_v43  ;;  %v1495_v6 = vpop.eup %1494 }
 0x1eb   : > { %1504 = vrcp.f32 %v780_v40  ;;  %1040 = vmatprep.mubr.bf16.mxu0 %v859_v52  ;;  %v847_v3 = vmul.f32 %v1495_v6, %v2143_v44  ;;  %v846_v4 = vmul.f32 %v1495_v6, %v2141_v29 }
 0x1ec   : > { %v804_v8 = vpop.xlane.xlu1 %803  ;;  %1041 = vmatmul.mubr.bf16.gmra.mxu0 %v858_v20 }
 0x1ed   : > { %v783_v25 = vpop.xlane.xlu0 %782  ;;  %v867_v45 = vpack.c.bf16 %v847_v3, %v845_v11  ;;  %v866_v22 = vpack.c.bf16 %v846_v4, %v844_v55  ;;  %v1497_v51 = vpop.eup %1496 }
 0x1ee   : > { %1506 = vrcp.f32 %v783_v25  ;;  %v833_v53 = vmul.f32 %v1497_v51, %v2151_v19  ;;  %v832_v44 = vmul.f32 %v1497_v51, %v2147_v50 }
 0x1ef   : > { %1508 = vrcp.f32 %v804_v8  ;;  %1072 = vmatprep.mubr.bf16.mxu1 %v867_v45 }
 0x1f0   : > { %1073 = vmatmul.mubr.bf16.gmra.mxu1 %v866_v22 }
 0x1f1   : > { %v807_v21 = vpop.xlane.xlu0 %806 }
 0x1f2   : > { %1510 = vrcp.f32 %v807_v21 }
 0x1f3   : > { %v1499_v39 = vpop.eup %1498 }
 0x1f4   : > { %v835_v32 = vmul.f32 %v1499_v39, %v2163_v5  ;;  %v834_v47 = vmul.f32 %v1499_v39, %v2157_v23  ;;  %v1501_v29 = vpop.eup %1500 }
 0x1f5   : > { %v849_v41 = vmul.f32 %v1501_v29, %v2161_v58  ;;  %v848_v31 = vmul.f32 %v1501_v29, %v2159_v15 }
 0x1f6   : > { %v861_v42 = vpack.c.bf16 %v835_v32, %v833_v53  ;;  %v860_v28 = vpack.c.bf16 %v834_v47, %v832_v44 }
 0x1f7   : > { %v1503_v26 = vpop.eup %1502 }
 0x1f8   : > { %1048 = vmatprep.mubr.bf16.mxu0 %v861_v42  ;;  %v851_v7 = vmul.f32 %v1503_v26, %v2177_v2  ;;  %v850_v46 = vmul.f32 %v1503_v26, %v2167_v37  ;;  %v1505_v19 = vpop.eup %1504 }
 0x1f9   : > { %1049 = vmatmul.mubr.bf16.gmra.mxu0 %v860_v28  ;;  %v837_v23 = vmul.f32 %v1505_v19, %v2175_v1  ;;  %v836_v36 = vmul.f32 %v1505_v19, %v2171_v18 }
 0x1fa   : > { %v869_v5 = vpack.c.bf16 %v851_v7, %v849_v41  ;;  %v868_v10 = vpack.c.bf16 %v850_v46, %v848_v31 }
 0x1fb   : > { %v1507_v50 = vpop.eup %1506 }
 0x1fc   : > { %1080 = vmatprep.mubr.bf16.mxu1 %v869_v5  ;;  %v839_v13 = vmul.f32 %v1507_v50, %v2191_v61  ;;  %v838_v58 = vmul.f32 %v1507_v50, %v2181_v63  ;;  %v1509_v49 = vpop.eup %1508 }
 0x1fd   : > { %1081 = vmatmul.mubr.bf16.gmra.mxu1 %v868_v10  ;;  %v853_v33 = vmul.f32 %v1509_v49, %v2187_v30  ;;  %v852_v62 = vmul.f32 %v1509_v49, %v2185_v14 }
 0x1fe   : > { %v863_v15 = vpack.c.bf16 %v839_v13, %v837_v23  ;;  %v862_v2 = vpack.c.bf16 %v838_v58, %v836_v36 }
 0x1ff   : > { %v1511_v37 = vpop.eup %1510 }
 0x200   : > { %1056 = vmatprep.mubr.bf16.mxu0 %v863_v15  ;;  %v855_v38 = vmul.f32 %v1511_v37, %v2199_v56  ;;  %v854_v1 = vmul.f32 %v1511_v37, %v2195_v0 }
 0x201   : > { %1057 = vmatmul.mubr.bf16.gmra.mxu0 %v862_v2 }
 0x202   : > { %v871_v61 = vpack.c.bf16 %v855_v38, %v853_v33  ;;  %v870_v18 = vpack.c.bf16 %v854_v1, %v852_v62 }
 0x204   : > { %1088 = vmatprep.mubr.bf16.mxu1 %v871_v61 }
 0x205   : > { %1089 = vmatmul.mubr.bf16.gmra.mxu1 %v870_v18 }
 0x29f   : > { %v1293_v63 = vpop.f32.mrf.mxu0 }
 0x2a1   : > { %v1294_v30 = vpop.f32.mrf.mxu0 }
 0x2a2   : > { %v1295_v14 = vadd.f32 %v1294_v30, %v1293_v63 }
 0x2a3   : > { %v1296_v0 = vpop.f32.mrf.mxu0  ;;  %v1317_v56 = vpop.f32.mrf.mxu1 }
 0x2a4   : > { %1098 = vst.msk [vmem:[%s2241_s22] sm:$0xff] %vm1097_vm0, %v1295_v14 }
 0x2a5   : > { %v1297_v60 = vpop.f32.mrf.mxu0  ;;  %v1318_v9 = vpop.f32.mrf.mxu1 }
 0x2a6   : > { %v1298_v12 = vadd.f32 %v1297_v60, %v1296_v0  ;;  %v1319_v54 = vadd.f32 %v1318_v9, %v1317_v56 }
 0x2a7   : > { %v1320_v34 = vpop.f32.mrf.mxu1 }
 0x2a8   : > { %1099 = vst.msk [vmem:[%s2241_s22 + $0x8] sm:$0xff] %vm1097_vm0, %v1298_v12  ;;  %1106 = vst.msk [vmem:[%s2241_s22 + $0x40] sm:$0xff] %vm1097_vm0, %v1319_v54 }
 0x2a9   : > { %v1321_v35 = vpop.f32.mrf.mxu1 }
 0x2aa   : > { %v1322_v27 = vadd.f32 %v1321_v35, %v1320_v34 }
 0x2ac   : > { %v1299_v48 = vpop.f32.mrf.mxu0  ;;  %1107 = vst.msk [vmem:[%s2241_s22 + $0x48] sm:$0xff] %vm1097_vm0, %v1322_v27 }
 0x2ae   : > { %v1300_v40 = vpop.f32.mrf.mxu0 }
 0x2af   : > { %v1301_v43 = vadd.f32 %v1300_v40, %v1299_v48 }
 0x2b0   : > { %v1302_v57 = vpop.f32.mrf.mxu0  ;;  %v1323_v16 = vpop.f32.mrf.mxu1 }
 0x2b1   : > { %1100 = vst.msk [vmem:[%s2241_s22 + $0x10] sm:$0xff] %vm1097_vm0, %v1301_v43 }
 0x2b2   : > { %v1303_v59 = vpop.f32.mrf.mxu0  ;;  %v1324_v17 = vpop.f32.mrf.mxu1 }
 0x2b3   : > { %v1304_v24 = vadd.f32 %v1303_v59, %v1302_v57  ;;  %v1325_v52 = vadd.f32 %v1324_v17, %v1323_v16 }
 0x2b4   : > { %v1326_v20 = vpop.f32.mrf.mxu1 }
 0x2b5   : > { %1101 = vst.msk [vmem:[%s2241_s22 + $0x18] sm:$0xff] %vm1097_vm0, %v1304_v24  ;;  %1108 = vst.msk [vmem:[%s2241_s22 + $0x50] sm:$0xff] %vm1097_vm0, %v1325_v52 }
 0x2b6   : > { %v1327_v6 = vpop.f32.mrf.mxu1 }
 0x2b7   : > { %v1328_v25 = vadd.f32 %v1327_v6, %v1326_v20 }
 0x2b9   : > { %v1305_v8 = vpop.f32.mrf.mxu0  ;;  %1109 = vst.msk [vmem:[%s2241_s22 + $0x58] sm:$0xff] %vm1097_vm0, %v1328_v25 }
 0x2bb   : > { %v1306_v11 = vpop.f32.mrf.mxu0 }
 0x2bc   : > { %v1307_v3 = vadd.f32 %v1306_v11, %v1305_v8 }
 0x2bd   : > { %v1308_v55 = vpop.f32.mrf.mxu0  ;;  %v1329_v4 = vpop.f32.mrf.mxu1 }
 0x2be   : > { %1102 = vst.msk [vmem:[%s2241_s22 + $0x20] sm:$0xff] %vm1097_vm0, %v1307_v3 }
 0x2bf   : > { %v1309_v45 = vpop.f32.mrf.mxu0  ;;  %v1330_v22 = vpop.f32.mrf.mxu1 }
 0x2c0   : > { %v1310_v51 = vadd.f32 %v1309_v45, %v1308_v55  ;;  %v1331_v21 = vadd.f32 %v1330_v22, %v1329_v4 }
 0x2c1   : > { %v1311_v39 = vpop.f32.mrf.mxu0  ;;  %v1332_v53 = vpop.f32.mrf.mxu1 }
 0x2c2   : > { %1103 = vst.msk [vmem:[%s2241_s22 + $0x28] sm:$0xff] %vm1097_vm0, %v1310_v51  ;;  %1110 = vst.msk [vmem:[%s2241_s22 + $0x60] sm:$0xff] %vm1097_vm0, %v1331_v21 }
 0x2c3   : > { %v1312_v32 = vpop.f32.mrf.mxu0  ;;  %v1333_v44 = vpop.f32.mrf.mxu1 }
 0x2c4   : > { %v1313_v47 = vadd.f32 %v1312_v32, %v1311_v39  ;;  %v1334_v29 = vadd.f32 %v1333_v44, %v1332_v53 }
 0x2c5   : > { %v1314_v42 = vpop.f32.mrf.mxu0  ;;  %v1335_v28 = vpop.f32.mrf.mxu1 }
 0x2c6   : > { %1104 = vst.msk [vmem:[%s2241_s22 + $0x30] sm:$0xff] %vm1097_vm0, %v1313_v47  ;;  %1111 = vst.msk [vmem:[%s2241_s22 + $0x68] sm:$0xff] %vm1097_vm0, %v1334_v29 }
 0x2c7   : > { %v1315_v26 = vpop.f32.mrf.mxu0  ;;  %v1336_v41 = vpop.f32.mrf.mxu1 }
 0x2c8   : > { %v1316_v7 = vadd.f32 %v1315_v26, %v1314_v42  ;;  %v1337_v31 = vadd.f32 %v1336_v41, %v1335_v28 }
 0x2c9   : > { %v1338_v46 = vpop.f32.mrf.mxu1 }
 0x2ca   : > { %1105 = vst.msk [vmem:[%s2241_s22 + $0x38] sm:$0xff] %vm1097_vm0, %v1316_v7  ;;  %1112 = vst.msk [vmem:[%s2241_s22 + $0x70] sm:$0xff] %vm1097_vm0, %v1337_v31 }
 0x2cb   : > { %v1339_v19 = vpop.f32.mrf.mxu1 }
 0x2cc   : > { %v1340_v5 = vadd.f32 %v1339_v19, %v1338_v46 }
 0x2ce   : > { %1113 = vst.msk [vmem:[%s2241_s22 + $0x78] sm:$0xff] %vm1097_vm0, %v1340_v5 }
 0x2cf PF: > { %s14_s19 = sadd.s32 1, %s1550_s19   ;;  %s2311_s15 = smov %s1542_s17 }
 0x2d0   : > { %p11_p7 = scmp.ge.s32.totalorder %s14_s19, 10   ;;  %s2312_s16 = smov %s1546_s18 }
 0x2d1   : > { %s2313_s17 = smov %s2316_s20  ;;  %s2314_s18 = smov %s2320_s21 }
 0x2d2   :  { %13 = sbr.rel (!%p11_p7) target bundleno = 3 (0x3), region = 75 }

</bundles_post_ra>
